<compile_context>
chip_gen: v7x
topology: tpu7x:2x2x1
jax: 0.10.0
libtpu: 0.0.40
codegen_flags: <defaults>
</compile_context>

<pallas_src>
import functools

import jax
import jax.numpy as jnp
from jax.experimental import pallas as pl
from jax.experimental.pallas import tpu as pltpu


def _round_up(x, m):
    return (x + m - 1) // m * m


def _pick_tile_m(mp):
    # mp is always a multiple of 8; returned tile is a multiple of 16 or == mp.
    for cand in (256, 128, 64, 32, 16):
        if mp % cand == 0:
            return cand
    return mp


# ----------------------------- Pallas kernels ------------------------------

def _gemm_affine_kernel(x_ref, w_ref, s_ref, b_ref, o_ref, acc_ref, *, relu):
    """acc += x_tap @ w_tap over the tap grid axis; epilogue: affine (+ReLU)."""
    t = pl.program_id(2)

    @pl.when(t == 0)
    def _():
        acc_ref[...] = jnp.zeros_like(acc_ref)

    acc_ref[...] += jnp.dot(x_ref[0], w_ref[0],
                            preferred_element_type=jnp.float32)

    @pl.when(t == pl.num_programs(2) - 1)
    def _():
        r = acc_ref[...] * s_ref[...] + b_ref[...]
        if relu:
            r = jnp.maximum(r, 0.0)
        o_ref[...] = r.astype(o_ref.dtype)


def _gemm_affine_res_kernel(x_ref, w_ref, s_ref, b_ref, r_ref, o_ref, acc_ref,
                            *, relu):
    """Same as above, plus residual add in the epilogue (then ReLU)."""
    t = pl.program_id(2)

    @pl.when(t == 0)
    def _():
        acc_ref[...] = jnp.zeros_like(acc_ref)

    acc_ref[...] += jnp.dot(x_ref[0], w_ref[0],
                            preferred_element_type=jnp.float32)

    @pl.when(t == pl.num_programs(2) - 1)
    def _():
        r = acc_ref[...] * s_ref[...] + b_ref[...] + r_ref[...].astype(jnp.float32)
        if relu:
            r = jnp.maximum(r, 0.0)
        o_ref[...] = r.astype(o_ref.dtype)


def _max_taps_kernel(x_ref, o_ref):
    # VPU max over the leading tap axis; lane-dense [rows, lane] layout.
    m = x_ref[0]
    for i in range(1, x_ref.shape[0]):
        m = jnp.maximum(m, x_ref[i])
    o_ref[...] = m


_VMEM = pl.BlockSpec(memory_space=pltpu.MemorySpace.VMEM)


# ----------------------------- GEMM wrapper ---------------------------------

def gemm_taps_affine(xt, w_t, scale, bias, residual=None, *, relu=False,
                     out_dtype=jnp.bfloat16):
    """Gridded, pipelined GEMM with the kernel-tap axis as reduction axis.

    xt:       [T, M, K]    activation taps (bf16 on the MXU)
    w_t:      [T, K, Cout] weights
    scale/bias: [Cout]     folded-BN per-channel affine (f32)
    residual: [M, Cout] or None
    Returns [M, Cout] in out_dtype.
    """
    t_, m, k = xt.shape
    cout = w_t.shape[2]

    mp = _round_up(m, 8)
    kp = _round_up(k, 128)          # lane-aligned contraction
    coutp = _round_up(cout, 128)    # lane-dense output stores
    tm = _pick_tile_m(mp)
    tn = 128

    xt_p = jnp.pad(xt.astype(jnp.bfloat16), ((0, 0), (0, mp - m), (0, kp - k)))
    w_p = jnp.pad(w_t.astype(jnp.bfloat16), ((0, 0), (0, kp - k), (0, coutp - cout)))
    s_p = jnp.pad(scale.astype(jnp.float32), (0, coutp - cout)).reshape(1, coutp)
    b_p = jnp.pad(bias.astype(jnp.float32), (0, coutp - cout)).reshape(1, coutp)

    in_specs = [
        pl.BlockSpec((1, tm, kp), lambda i, j, t: (t, i, 0)),
        pl.BlockSpec((1, kp, tn), lambda i, j, t: (t, 0, j)),
        pl.BlockSpec((1, tn), lambda i, j, t: (0, j)),
        pl.BlockSpec((1, tn), lambda i, j, t: (0, j)),
    ]
    args = [xt_p, w_p, s_p, b_p]
    res_bytes = 0
    if residual is not None:
        r_p = jnp.pad(residual.astype(jnp.bfloat16),
                      ((0, mp - m), (0, coutp - cout)))
        in_specs.append(pl.BlockSpec((tm, tn), lambda i, j, t: (i, j)))
        args.append(r_p)
        res_bytes = r_p.size * 2
        kern = functools.partial(_gemm_affine_res_kernel, relu=relu)
    else:
        kern = functools.partial(_gemm_affine_kernel, relu=relu)

    cost = pl.CostEstimate(
        flops=2 * t_ * mp * kp * coutp,
        transcendentals=0,
        bytes_accessed=int(xt_p.size * 2 + w_p.size * 2 + res_bytes
                           + mp * coutp * jnp.dtype(out_dtype).itemsize),
    )

    out = pl.pallas_call(
        kern,
        out_shape=jax.ShapeDtypeStruct((mp, coutp), out_dtype),
        grid_spec=pltpu.PrefetchScalarGridSpec(
            num_scalar_prefetch=0,
            grid=(mp // tm, coutp // tn, t_),
            in_specs=in_specs,
            out_specs=pl.BlockSpec((tm, tn), lambda i, j, t: (i, j)),
            scratch_shapes=[pltpu.VMEM((tm, tn), jnp.float32)],
        ),
        compiler_params=pltpu.CompilerParams(
            dimension_semantics=("parallel", "parallel", "arbitrary")),
        cost_estimate=cost,
    )(*args)
    return out[:m, :cout]


# ------------------------------ JAX glue ops --------------------------------

def _conv_taps_nhwc(x, kh, kw, stride, pad):
    """x: [N, H, W, C] -> taps [KH*KW, N*OH*OW, C] (tap-major, no transpose)."""
    n, h, w, c = x.shape
    xp = jnp.pad(x, ((0, 0), (pad, pad), (pad, pad), (0, 0)))
    oh = (h + 2 * pad - kh) // stride + 1
    ow = (w + 2 * pad - kw) // stride + 1
    taps = []
    for i in range(kh):
        for j in range(kw):
            taps.append(xp[:, i:i + stride * (oh - 1) + 1:stride,
                           j:j + stride * (ow - 1) + 1:stride, :])
    xt = jnp.stack(taps, axis=0).reshape(kh * kw, n * oh * ow, c)
    return xt, oh, ow


def conv_bn(x, w, scale, bias, *, stride, pad, relu, residual=None):
    """Fused conv (no bias) + folded-BN affine (+ residual) (+ ReLU). NHWC."""
    cout, cin, kh, kw = w.shape
    n = x.shape[0]
    xt, oh, ow = _conv_taps_nhwc(x, kh, kw, stride, pad)
    w_t = jnp.transpose(w, (2, 3, 1, 0)).reshape(kh * kw, cin, cout)
    res = None
    if residual is not None:
        res = residual.reshape(n * oh * ow, cout)      # NHWC -> [M, Cout], no transpose
    out = gemm_taps_affine(xt, w_t, scale, bias, res, relu=relu)
    return out.reshape(n, oh, ow, cout)


def maxpool_3x3_s2_p1(x):
    """PyTorch MaxPool2d(3, stride=2, padding=1), NHWC. Input is post-ReLU
    (>= 0), so zero padding is equivalent to -inf padding here."""
    n, h, w, c = x.shape
    k, s, pad = 3, 2, 1
    xp = jnp.pad(x, ((0, 0), (pad, pad), (pad, pad), (0, 0)))
    oh = (h + 2 * pad - k) // s + 1
    ow = (w + 2 * pad - k) // s + 1
    taps = [xp[:, i:i + s * (oh - 1) + 1:s, j:j + s * (ow - 1) + 1:s, :]
            for i in range(k) for j in range(k)]
    total = n * oh * ow * c
    lane = 512 if total % 512 == 0 else c              # lane-dense reduce layout
    rows = total // lane
    stacked = jnp.stack(taps, axis=0).reshape(k * k, rows, lane)
    out = pl.pallas_call(
        _max_taps_kernel,
        out_shape=jax.ShapeDtypeStruct((rows, lane), x.dtype),
        in_specs=[_VMEM],
        out_specs=_VMEM,
    )(stacked)
    return out.reshape(n, oh, ow, c)


# ------------------------- deterministic parameters -------------------------

def _fold_bn(gamma, beta, mean, var, eps=1e-5):
    scale = gamma / jnp.sqrt(var + eps)
    bias = beta - mean * scale
    return scale, bias


def _init_conv(key, cout, cin, kh, kw):
    fan_in = cin * kh * kw
    std = (2.0 / fan_in) ** 0.5
    return jax.random.normal(key, (cout, cin, kh, kw), jnp.float32) * std


def _init_bn(key, c):
    k1, k2 = jax.random.split(key)
    gamma = 1.0 + 0.1 * jax.random.normal(k1, (c,), jnp.float32)
    beta = 0.1 * jax.random.normal(k2, (c,), jnp.float32)
    mean = jnp.zeros((c,), jnp.float32)
    var = jnp.ones((c,), jnp.float32)
    return _fold_bn(gamma, beta, mean, var)


def make_resnet18_params(key, num_classes=10):
    keys = iter(jax.random.split(key, 128))
    params = {
        "conv1_w": _init_conv(next(keys), 64, 3, 7, 7),
        "bn1": _init_bn(next(keys), 64),
    }
    # (in_planes, planes, stride_of_first_block), 2 BasicBlocks per layer
    layer_cfg = [(64, 64, 1), (64, 128, 2), (128, 256, 2), (256, 512, 2)]
    layers = []
    for (inpl, planes, stride) in layer_cfg:
        blocks = []
        for b in range(2):
            s = stride if b == 0 else 1
            cin = inpl if b == 0 else planes
            blk = {
                "conv1_w": _init_conv(next(keys), planes, cin, 3, 3),
                "bn1": _init_bn(next(keys), planes),
                "conv2_w": _init_conv(next(keys), planes, planes, 3, 3),
                "bn2": _init_bn(next(keys), planes),
                "stride": s,
            }
            if s != 1 or cin != planes:
                blk["down_w"] = _init_conv(next(keys), planes, cin, 1, 1)
                blk["down_bn"] = _init_bn(next(keys), planes)
            blocks.append(blk)
        layers.append(blocks)
    params["layers"] = layers
    params["fc_w"] = jax.random.normal(next(keys), (num_classes, 512),
                                       jnp.float32) * (1.0 / 512) ** 0.5
    params["fc_b"] = jnp.zeros((num_classes,), jnp.float32)
    return params


# ------------------------------ forward pass --------------------------------

def basic_block(x, blk):
    stride = blk["stride"]
    identity = x
    out = conv_bn(x, blk["conv1_w"], *blk["bn1"], stride=stride, pad=1, relu=True)
    if "down_w" in blk:
        identity = conv_bn(x, blk["down_w"], *blk["down_bn"],
                           stride=stride, pad=0, relu=False)
    # second conv: BN + residual add + ReLU fused in the Pallas epilogue
    out = conv_bn(out, blk["conv2_w"], *blk["bn2"],
                  stride=1, pad=1, relu=True, residual=identity)
    return out


def classifier_forward(params, x_nchw):
    """Equivalent of Classifier.forward(x) for classifier='resnet18' (eval)."""
    # single layout conversion at the model boundary: NCHW -> NHWC, bf16
    x = jnp.transpose(x_nchw, (0, 2, 3, 1)).astype(jnp.bfloat16)
    x = conv_bn(x, params["conv1_w"], *params["bn1"], stride=2, pad=3, relu=True)
    x = maxpool_3x3_s2_p1(x)
    for blocks in params["layers"]:
        for blk in blocks:
            x = basic_block(x, blk)
    # adaptive_avg_pool2d(1) + flatten (glue: mean over spatial dims)
    feat = x.astype(jnp.float32).mean(axis=(1, 2))                 # [N, 512]
    num_classes = params["fc_w"].shape[0]
    xt = feat.astype(jnp.bfloat16)[None]                           # [1, N, 512]
    w_t = jnp.transpose(params["fc_w"], (1, 0))[None]              # [1, 512, nc]
    logits = gemm_taps_affine(xt, w_t,
                              jnp.ones((num_classes,), jnp.float32),
                              params["fc_b"], relu=False,
                              out_dtype=jnp.float32)
    return logits


# ---------------------------------- main -------------------------------------

if __name__ == "__main__":
    key = jax.random.PRNGKey(0)
    kp, kx = jax.random.split(key)
    params = make_resnet18_params(kp, num_classes=10)
    x = jax.random.normal(kx, (2, 3, 32, 32), jnp.float32)   # NCHW input
    logits = classifier_forward(params, x)
    jax.block_until_ready(logits)
    assert logits.shape == (2, 10)
    print("KERNEL_OK")
</pallas_src>

<mosaic_0001>
module attributes {stable_mosaic.version = 11 : i64} {
  func.func @_gemm_affine_kernel(%arg0: i32, %arg1: i32, %arg2: i32, %arg3: memref<1x256x128xbf16, #tpu.memory_space<vmem>>, %arg4: memref<1x128x128xbf16, #tpu.memory_space<vmem>>, %arg5: memref<1x128xf32, #tpu.memory_space<vmem>>, %arg6: memref<1x128xf32, #tpu.memory_space<vmem>>, %arg7: memref<256x128xbf16, #tpu.memory_space<vmem>>, %arg8: memref<256x128xf32, #tpu.memory_space<vmem>>) attributes {dimension_semantics = [#tpu.dimension_semantics<parallel>, #tpu.dimension_semantics<parallel>, #tpu.dimension_semantics<arbitrary>], iteration_bounds = array<i64: 2, 1, 49>, scalar_prefetch = 0 : i64, scratch_operands = 1 : i64, tpu.core_type = #tpu.core_type<tc>, window_params = [{transform_indices = @transform_0, window_bounds = array<i64: 1, 256, 128>}, {transform_indices = @transform_1, window_bounds = array<i64: 1, 128, 128>}, {transform_indices = @transform_2, window_bounds = array<i64: 1, 128>}, {transform_indices = @transform_3, window_bounds = array<i64: 1, 128>}, {transform_indices = @transform_4, window_bounds = array<i64: 256, 128>}]} {
    %c0_i32 = arith.constant 0 : i32
    %0 = arith.cmpi eq, %arg2, %c0_i32 : i32
    %1 = arith.extui %0 : i1 to i32
    %c0_i32_0 = arith.constant 0 : i32
    %2 = arith.cmpi ne, %1, %c0_i32_0 : i32
    scf.if %2 {
      %cst_11 = arith.constant 0.000000e+00 : f32
      %14 = vector.broadcast %cst_11 : f32 to vector<256x128xf32>
      %c0_12 = arith.constant 0 : index
      %c0_13 = arith.constant 0 : index
      %15 = vector.load %arg8[%c0_12, %c0_13] : memref<256x128xf32, #tpu.memory_space<vmem>>, vector<256x128xf32>
      tpu.vector_store %arg8[%c0_12, %c0_13], %14 {strides = array<i32>} : memref<256x128xf32, #tpu.memory_space<vmem>>, vector<256x128xf32>,
    } else {
    }
    %c0 = arith.constant 0 : index
    %c0_1 = arith.constant 0 : index
    %3 = vector.load %arg8[%c0, %c0_1] : memref<256x128xf32, #tpu.memory_space<vmem>>, vector<256x128xf32>
    %c0_2 = arith.constant 0 : index
    %c0_3 = arith.constant 0 : index
    %c0_4 = arith.constant 0 : index
    %4 = vector.load %arg3[%c0_2, %c0_3, %c0_4] : memref<1x256x128xbf16, #tpu.memory_space<vmem>>, vector<1x256x128xbf16>
    %5 = vector.shape_cast %4 : vector<1x256x128xbf16> to vector<256x128xbf16>
    %c0_5 = arith.constant 0 : index
    %c0_6 = arith.constant 0 : index
    %c0_7 = arith.constant 0 : index
    %6 = vector.load %arg4[%c0_5, %c0_6, %c0_7] : memref<1x128x128xbf16, #tpu.memory_space<vmem>>, vector<1x128x128xbf16>
    %7 = vector.shape_cast %6 : vector<1x128x128xbf16> to vector<128x128xbf16>
    %cst = arith.constant dense<0.000000e+00> : vector<256x128xf32>
    %8 = tpu.matmul %5, %7, %cst {dimension_numbers = #tpu.dot_dimension_numbers<[1], [0], [0], [1], [0, 0, 1, 1], [], []>} : vector<256x128xbf16>, vector<128x128xbf16>, vector<256x128xf32> -> vector<256x128xf32>
    %9 = arith.addf %3, %8 : vector<256x128xf32>
    %c0_8 = arith.constant 0 : index
    %c0_9 = arith.constant 0 : index
    %10 = vector.load %arg8[%c0_8, %c0_9] : memref<256x128xf32, #tpu.memory_space<vmem>>, vector<256x128xf32>
    tpu.vector_store %arg8[%c0_8, %c0_9], %9 {strides = array<i32>} : memref<256x128xf32, #tpu.memory_space<vmem>>, vector<256x128xf32>,
    %c48_i32 = arith.constant 48 : i32
    %11 = arith.cmpi eq, %arg2, %c48_i32 : i32
    %12 = arith.extui %11 : i1 to i32
    %c0_i32_10 = arith.constant 0 : i32
    %13 = arith.cmpi ne, %12, %c0_i32_10 : i32
    scf.if %13 {
      %c0_11 = arith.constant 0 : index
      %c0_12 = arith.constant 0 : index
      %14 = vector.load %arg8[%c0_11, %c0_12] : memref<256x128xf32, #tpu.memory_space<vmem>>, vector<256x128xf32>
      %c0_13 = arith.constant 0 : index
      %c0_14 = arith.constant 0 : index
      %15 = vector.load %arg5[%c0_13, %c0_14] : memref<1x128xf32, #tpu.memory_space<vmem>>, vector<1x128xf32>
      %16 = vector.broadcast %15 : vector<1x128xf32> to vector<256x128xf32>
      %17 = arith.mulf %14, %16 : vector<256x128xf32>
      %c0_15 = arith.constant 0 : index
      %c0_16 = arith.constant 0 : index
      %18 = vector.load %arg6[%c0_15, %c0_16] : memref<1x128xf32, #tpu.memory_space<vmem>>, vector<1x128xf32>
      %19 = vector.broadcast %18 : vector<1x128xf32> to vector<256x128xf32>
      %20 = arith.addf %17, %19 : vector<256x128xf32>
      %cst_17 = arith.constant 0.000000e+00 : f32
      %21 = vector.broadcast %cst_17 : f32 to vector<256x128xf32>
      %22 = arith.maximumf %20, %21 : vector<256x128xf32>
      %23 = arith.truncf %22 : vector<256x128xf32> to vector<256x128xbf16>
      %c0_18 = arith.constant 0 : index
      %c0_19 = arith.constant 0 : index
      %24 = vector.load %arg7[%c0_18, %c0_19] : memref<256x128xbf16, #tpu.memory_space<vmem>>, vector<256x128xbf16>
      tpu.vector_store %arg7[%c0_18, %c0_19], %23 {strides = array<i32>} : memref<256x128xbf16, #tpu.memory_space<vmem>>, vector<256x128xbf16>,
    } else {
    }
    return
  }
  func.func @transform_0(%arg0: i32, %arg1: i32, %arg2: i32) -> (i32, i32, i32) {
    %c0_i32 = arith.constant 0 : i32
    %c0_i32_0 = arith.constant 0 : i32
    return %arg2, %arg0, %c0_i32 : i32, i32, i32
  }
  func.func @transform_1(%arg0: i32, %arg1: i32, %arg2: i32) -> (i32, i32, i32) {
    %c0_i32 = arith.constant 0 : i32
    %c0_i32_0 = arith.constant 0 : i32
    return %arg2, %c0_i32, %arg1 : i32, i32, i32
  }
  func.func @transform_2(%arg0: i32, %arg1: i32, %arg2: i32) -> (i32, i32) {
    %c0_i32 = arith.constant 0 : i32
    %c0_i32_0 = arith.constant 0 : i32
    return %c0_i32, %arg1 : i32, i32
  }
  func.func @transform_3(%arg0: i32, %arg1: i32, %arg2: i32) -> (i32, i32) {
    %c0_i32 = arith.constant 0 : i32
    %c0_i32_0 = arith.constant 0 : i32
    return %c0_i32, %arg1 : i32, i32
  }
  func.func @transform_4(%arg0: i32, %arg1: i32, %arg2: i32) -> (i32, i32) {
    %c0_i32 = arith.constant 0 : i32
    return %arg0, %arg1 : i32, i32
  }
}

</mosaic_0001>

<bundles_post_ra>
// kernel: tpu_custom_call.1
= control target key start
LH: loop header
LB: loop body
LE: loop exit
PB: predicated region body
PF: predicated region fallthrough
CT: control target
= control target key end

     0   :  { %s2595_s0 = inlined_call_operand.hbm [shape: bf16[49,512,128], index: 0, kind: input, shape index: {}]   ;;  %s2596_s1 = inlined_call_operand.hbm [shape: bf16[49,128,128], index: 1, kind: input, shape index: {}]   ;;  %s2597_s2 = inlined_call_operand.hbm [shape: f32[1,128], index: 2, kind: input, shape index: {}]   ;;  %s2598_s3 = inlined_call_operand.hbm [shape: f32[1,128], index: 3, kind: input, shape index: {}]   ;;  %s2599_s4 = inlined_call_operand.hbm [shape: bf16[512,128], index: 4, kind: output, shape index: {}]  }
   0x1   :  { %2616 = sst [smem:[#allocation25_spill]] %s2595_s0 }
   0x2   :  { %2617 = sst [smem:[#allocation26_spill]] %s2597_s2 }
   0x3   :  { %2618 = sst [smem:[#allocation27_spill]] %s2598_s3 }
   0x4   :  { %2619 = sst [smem:[#allocation28_spill]] %s2599_s4 }
   0x5   :  { %9 = vsyncpa [#allocation4], 0 }
   0x6   :  { %11 = vsyncpa [#allocation4 + $0x1], 0 }
   0x7   :  { %12 = vsyncpa [#allocation7], 0 }
   0x8   :  { %14 = vsyncpa [#allocation7 + $0x1], 0 }
   0x9   :  { %15 = vsyncpa [#allocation10], 0 }
   0xa   :  { %16 = vsyncpa [#allocation5], 0 }
   0xb   :  { %18 = vsyncpa [#allocation5 + $0x1], 0  ;;  %s2065_s15 = smov 0   ;;  %s2067_s16 = smov 0  }
   0xc   :  { %s2069_s17 = smov 0   ;;  %s2071_s18 = smov 0  }
   0xd   :  { %s2073_s19 = smov 0   ;;  %s2075_s20 = smov 0  }
   0xe   :  { %s2077_s21 = smov 0   ;;  %s2079_s22 = smov 0  }
   0xf   :  { %s2081_s23 = smov 0   ;;  %s2083_s24 = smov 0  }
  0x10   :  { %s2085_s25 = smov 0   ;;  %s2087_s26 = smov 0  }
  0x11   :  { %s2089_s27 = smov 0   ;;  %s2091_s28 = smov 0  }
  0x12 LB: > { %2620 = sst [smem:[#allocation17_spill]] %s1976_s15  ;;  %s2132_s29 = sadd.s32 4294967295, %s2028_s28   ;;  %s2028_s28 = sphi %s2091_s28, %s24_s28   ;;  %s2024_s27 = sphi %s2089_s27, %s2679_s27   ;;  %s2020_s26 = sphi %s2087_s26, %s2678_s26   ;;  %s2016_s25 = sphi %s2085_s25, %s2677_s25   ;;  %s2012_s24 = sphi %s2083_s24, %s2676_s24   ;;  %s2008_s23 = sphi %s2081_s23, %s2675_s23   ;;  %s2004_s22 = sphi %s2079_s22, %s2674_s22   ;;  %s2000_s21 = sphi %s2077_s21, %s2673_s21   ;;  %s1996_s20 = sphi %s2075_s20, %s2672_s20   ;;  %s1992_s19 = sphi %s2073_s19, %s2671_s19   ;;  %s1988_s18 = sphi %s2071_s18, %s2670_s18   ;;  %s1984_s17 = sphi %s2069_s17, %s2669_s17   ;;  %s1980_s16 = sphi %s2067_s16, %s2668_s16   ;;  %s1976_s15 = sphi %s2065_s15, %s2667_s15  }
  0x13   : > { %2621 = sst [smem:[#allocation18_spill]] %s1980_s16  ;;  %s1273_s30 = sadd.s32 4294967294, %s2028_s28  }
  0x14   : > { %2622 = sst [smem:[#allocation19_spill]] %s2012_s24  ;;  %p65_p0 = scmp.ne.s32.totalorder %s2004_s22, %s2000_s21 }
  0x15   : > { %2623 = sst [smem:[#allocation20_spill]] %s2016_s25  ;;  %p2603_p1 = scmp.eq.s32.totalorder %s2132_s29, 0 }
  0x16   : > { %p93_p2 = scmp.ne.s32.totalorder %s1992_s19, %s1988_s18  ;;  %p170_p4 = scmp.ne.s32.totalorder %s1984_s17, %s1980_s16 }
  0x17   : > { %p2141_p3 = por %p2603_p1, %p65_p0  ;;  %p171_p6 = scmp.eq.s32.totalorder %s2132_s29, 97 }
  0x18   : > { %p2149_p5 = por %p93_p2, %p2603_p1  ;;  %p176_p7 = scmp.ne.s32.totalorder %s1980_s16, %s1976_s15 }
  0x19   : > { %s2624_s6 = scalar_select %p2141_p3, 1, 0 }
  0x1a   : > { %s2625_s7 = scalar_select %p2149_p5, 1, 0 }
  0x1b   : > { %p177_p8 = scmp.eq.s32.totalorder %s1273_s30, 97  ;;  %p2156_p9 = por %p171_p6, %p170_p4 }
  0x1c   : > { %p1274_p10 = scmp.ge.s32.totalorder %s2028_s28, 1  ;;  %p184_p12 = scmp.lt.s32.totalorder %s2028_s28, 99 }
  0x1d   : > { %s2626_s8 = scalar_select %p2156_p9, 1, 0 }
  0x1e   : > { %p2161_p11 = por %p177_p8, %p176_p7  ;;  %p2166_p13 = pnand %p1274_p10, %p184_p12 }
  0x1f   : > { %2627 = sst [smem:[#allocation21_spill]] %s2626_s8  ;;  %s2030_s11 = smov [#allocation8]  }
  0x20   : > { %s2628_s9 = scalar_select %p2161_p11, 1, 0 }
  0x21   : > { %s2630_s10 = scalar_select %p2166_p13, 1, 0 }
  0x22   : > { %2629 = sst [smem:[#allocation22_spill]] %s2628_s9  ;;  %s199_s12 = sshll.u32 %s2030_s11, 4  ;;  %s200_s12 = int_to_ptr.vmem [resolvable:$true] %s199_s12 }
  0x23   : > { %p1587_p0 = pneg %p2166_p13  ;;  %s2031_s13 = smov [#allocation9]  }
  0x24   : > { %s212_s14 = sshll.u32 %s2031_s13, 4  ;;  %s2632_s2 = sld [smem:[#allocation26_spill]]  ;;  %s2178_s14 = int_to_ptr.vmem [resolvable:$true] %s212_s14 }
  0x25   : > { %p2174_p2 = pnand %p1587_p0, %p2603_p1 }
  0x27   : > { %p1756_p6 = pneg %p2174_p2 }
  0x2a   : > { %s1754_s5 = scalar_lea.hbm %s2632_s2, 16 }
  0x2b   : > { %p1755_p4 = scmp.ne.s32.totalorder %s2632_s2, %s1754_s5  ;;  %p1761_p10 = scmp.lt.u32.totalorder %s1754_s5, %s2632_s2 }
  0x2d   : > { %p1757_p7 = pnand %p1756_p6, %p1755_p4 }
  0x2f   : > { %p1758_p8 = pneg %p1757_p7 }
  0x31   : > { %p1763_p12 = pnand %p1761_p10, %p1758_p8 }
  0x33   : > { %1766 = shalt.err (!%p1763_p12)
}
  0x34   : > { %s1767_s4 = scalar_lea.vmem %s200_s12, 16  ;;  %s1774_s9 = scalar_lea.vmem %s200_s12, 32 }
  0x35   : > { %p1768_p0 = scmp.ne.s32.totalorder %s200_s12, %s1767_s4  ;;  %p1775_p9 = scmp.lt.s32.totalorder %s200_s12, %s200_s12 }
  0x36   : > { %p1776_p5 = scmp.lt.s32.totalorder %s1774_s9, %s1767_s4 }
  0x37   : > { %p1770_p1 = pnand %p1768_p0, %p1756_p6 }
  0x38   : > { %p1777_p3 = por %p1776_p5, %p1775_p9 }
  0x39   : > { %p1771_p11 = pneg %p1770_p1 }
  0x3b   : > { %p1778_p13 = pnand %p1777_p3, %p1771_p11 }
  0x3d   : > { %1781 = shalt.err (!%p1778_p13)
}
  0x3e   : > { %1590 = dma.hbm_to_vmem [thread:$0]  (!%p2174_p2), %s2632_s2, 16, %s200_s12, [#allocation7]  }
  0x3f   : > { %s2633_s3 = sld [smem:[#allocation27_spill]] }
  0x45   : > { %s1782_s11 = scalar_lea.hbm %s2633_s3, 16 }
  0x46   : > { %p1783_p1 = scmp.ne.s32.totalorder %s2633_s3, %s1782_s11  ;;  %p1789_p9 = scmp.lt.u32.totalorder %s1782_s11, %s2633_s3 }
  0x48   : > { %p1785_p5 = pnand %p1783_p1, %p1756_p6 }
  0x4a   : > { %p1786_p3 = pneg %p1785_p5 }
  0x4c   : > { %p1791_p11 = pnand %p1789_p9, %p1786_p3 }
  0x4e   : > { %1794 = shalt.err (!%p1791_p11)
}
  0x4f   : > { %s1795_s12 = scalar_lea.vmem %s2178_s14, 16  ;;  %s1802_s8 = scalar_lea.vmem %s2178_s14, 32 }
  0x50   : > { %p1796_p13 = scmp.ne.s32.totalorder %s2178_s14, %s1795_s12  ;;  %p1803_p8 = scmp.lt.s32.totalorder %s2178_s14, %s2178_s14 }
  0x51   : > { %p1804_p10 = scmp.lt.s32.totalorder %s1802_s8, %s1795_s12 }
  0x52   : > { %p1798_p4 = pnand %p1796_p13, %p1756_p6 }
  0x53   : > { %p1805_p12 = por %p1804_p10, %p1803_p8 }
  0x54   : > { %p1799_p7 = pneg %p1798_p4 }
  0x56   : > { %p1806_p0 = pnand %p1805_p12, %p1799_p7 }
  0x58   : > { %1809 = shalt.err (!%p1806_p0)
}
  0x59   : > { %1593 = dma.hbm_to_vmem [thread:$0]  (!%p2174_p2), %s2633_s3, 16, %s2178_s14, [#allocation10]  }
  0x5a   : > { %s36_s5 = sadd.s32 1, %s2020_s26  ;;  %s43_s30 = sadd.s32 1, %s2024_s27 }
  0x5b   : > { %p37_p6 = scmp.ge.s32.totalorder %s36_s5, 49  ;;  %s52_s18 = sadd.s32 1, %s2008_s23 }
  0x5c   : > { %p59_p1 = scmp.ne.s32.totalorder %s2008_s23, %s2004_s22  ;;  %p2615_p5 = scmp.eq.s32.totalorder %s2028_s28, 0 }
  0x5d   : > { %s2681_s5 = smov (%p37_p6, %s36_s5), 0  ;;  %s2683_s30 = smov (!%p37_p6, %s43_s30), %s2024_s27 }
  0x5e   : > { %2634 = sst [smem:[#allocation23_spill]] %s2681_s5  ;;  %s2239_s11 = ssub.s32 %s2020_s26, %s2681_s5 }
  0x5f   : > { %p2243_p2 = por %p2615_p5, %p59_p1  ;;  %p45_p3 = scmp.ge.s32.totalorder %s2683_s30, 2 }
  0x60   : > { %p78_p9 = scmp.eq.s32.totalorder %s2239_s11, 0  ;;  %p2614_p11 = scmp.lt.s32.totalorder %s2028_s28, 98 }
  0x61   : > { %s223_s13 = sand.u32 1, %s2008_s23   ;;  %s2685_s30 = smov (%p45_p3, %s2683_s30), 0 }
  0x62   : > { %2636 = sst [smem:[#allocation24_spill]] %s2685_s30  ;;  %s1278_s4 = sshll.u32 %s223_s13, 7 }
  0x63   : > { %s48_s9 = ssub.s32 %s2024_s27, %s2685_s30  ;;  %s1279_s8 = sshll.u32 %s2024_s27, 5 }
  0x64   : > { %s49_s12 = sor.u32 %s48_s9, %s2239_s11  ;;  %p158_p13 = scmp.eq.s32.totalorder %s48_s9, 0 }
  0x65   : > { %p50_p4 = scmp.eq.s32.totalorder %s49_s12, 0  ;;  %s2637_s21 = sadd.s32 1, %s1984_s17 }
  0x66   : > { %s2259_s15 = scalar_select %p158_p13, %s1984_s17, %s2637_s21  }
  0x67   : > { %s2262_s2 = scalar_select %p50_p4, %s2008_s23, %s52_s18  }
  0x68   : > { %s1280_s3 = sshll.u32 %s2020_s26, 6  ;;  %s227_s5 = scalar_lea.vmem [#allocation3], %s1278_s4 }
  0x69   : > { %s236_s25 = sshll.u32 %s227_s5, 4  ;;  %s233_s24 = sadd.s32 %s1280_s3, %s1279_s8  ;;  %s2265_s25 = int_to_ptr.vmem [resolvable:$true] %s236_s25 }
  0x6a   : > { %s1281_s16 = sshll.u32 %s233_s24, 6  ;;  %p2271_p7 = pnand %p2614_p11, %p2243_p2 }
  0x6b   : > { %s2639_s0 = sld [smem:[#allocation25_spill]]  ;;  %s2280_s3 = scalar_lea.sflag [#allocation4], %s223_s13 }
  0x6c   : > { %p1812_p10 = pneg %p2271_p7 }
  0x71   : > { %s2278_s18 = scalar_lea.hbm %s2639_s0, %s1281_s16  ;;  %s1815_s4 = scalar_lea.hbm %s2639_s0, 200704 }
  0x72   : > { %s1810_s24 = scalar_lea.hbm %s2278_s18, 2048  ;;  %p1816_p6 = scmp.lt.u32.totalorder %s2278_s18, %s2639_s0 }
  0x73   : > { %p1811_p8 = scmp.ne.s32.totalorder %s2278_s18, %s1810_s24  ;;  %p1817_p1 = scmp.lt.u32.totalorder %s1815_s4, %s1810_s24 }
  0x74   : > { %p1819_p3 = scmp.lt.u32.totalorder %s1810_s24, %s2278_s18 }
  0x75   : > { %p1813_p12 = pnand %p1812_p10, %p1811_p8  ;;  %p1818_p2 = por %p1817_p1, %p1816_p6 }
  0x77   : > { %p1814_p0 = pneg %p1813_p12  ;;  %p1820_p13 = por %p1819_p3, %p1818_p2 }
  0x79   : > { %p1821_p4 = pnand %p1820_p13, %p1814_p0 }
  0x7b   : > { %1824 = shalt.err (!%p1821_p4)
}
  0x7c   : > { %s1825_s13 = scalar_lea.vmem %s2265_s25, 2048  ;;  %s2032_s21 = smov [#allocation3]  }
  0x7d   : > { %p1826_p8 = scmp.ne.s32.totalorder %s2265_s25, %s1825_s13  ;;  %s1830_s9 = sshll.u32 %s2032_s21, 4  ;;  %s1831_s9 = int_to_ptr.vmem [resolvable:$false] %s1830_s9 }
  0x7e   : > { %s1832_s12 = scalar_lea.vmem %s1831_s9, 4096  ;;  %p1833_p5 = scmp.lt.s32.totalorder %s2265_s25, %s1831_s9 }
  0x7f   : > { %p1828_p12 = pnand %p1826_p8, %p1812_p10  ;;  %p1834_p6 = scmp.lt.s32.totalorder %s1832_s12, %s1825_s13 }
  0x81   : > { %p1829_p11 = pneg %p1828_p12  ;;  %p1835_p1 = por %p1834_p6, %p1833_p5 }
  0x83   : > { %p1836_p2 = pnand %p1835_p1, %p1829_p11 }
  0x85   : > { %1839 = shalt.err (!%p1836_p2)
}
  0x86   : > { %s2033_s24 = smov 64   ;;  %s2034_s5 = smov 4  }
  0x87   : > { %1597 = dma.hbm_to_vmem [thread:$0]  (!%p2271_p7), %s2278_s18, 2048, %s2265_s25, %s2280_s3, %s2033_s24, %s2033_s24, %s2034_s5  }
  0x88   : > { %s246_s14 = sand.u32 1, %s2028_s28   ;;  %s80_s4 = sadd.s32 1, %s1996_s20 }
  0x89   : > { %p87_p5 = scmp.ne.s32.totalorder %s1996_s20, %s1992_s19  ;;  %p2640_p11 = scmp.eq.s32.totalorder %s2028_s28, 0 }
  0x8a   : > { %s2318_s16 = scalar_select %p78_p9, %s1996_s20, %s80_s4  }
  0x8b   : > { %p89_p10 = por %p87_p5, %p2640_p11  ;;  %s248_s8 = sand.u32 1, %s1996_s20  }
  0x8c   : > { %s1282_s13 = sshll.u32 %s248_s8, 6  ;;  %s1356_s21 = sshll.u32 %s2020_s26, 10 }
  0x8d   : > { %s2327_s0 = scalar_lea.hbm %s2596_s1, %s1356_s21  ;;  %s250_s25 = scalar_lea.vmem [#allocation6], %s1282_s13 }
  0x8e   : > { %s258_s30 = sshll.u32 %s250_s25, 4  ;;  %p2641_p7 = scmp.lt.s32.totalorder %s2028_s28, 98  ;;  %s2335_s30 = int_to_ptr.vmem [resolvable:$true] %s258_s30 }
  0x8f   : > { %s2337_s18 = scalar_lea.sflag [#allocation7], %s246_s14  ;;  %s1840_s3 = scalar_lea.hbm %s2327_s0, 1024 }
  0x90   : > { %p2331_p0 = pnand %p2641_p7, %p89_p10  ;;  %p1841_p9 = scmp.ne.s32.totalorder %s2327_s0, %s1840_s3 }
  0x91   : > { %s1845_s13 = scalar_lea.hbm %s2596_s1, 50176  ;;  %p1846_p8 = scmp.lt.u32.totalorder %s2327_s0, %s2596_s1 }
  0x92   : > { %p1842_p3 = pneg %p2331_p0  ;;  %p1847_p12 = scmp.lt.u32.totalorder %s1845_s13, %s1840_s3 }
  0x93   : > { %p1849_p1 = scmp.lt.u32.totalorder %s1840_s3, %s2327_s0 }
  0x94   : > { %p1843_p13 = pnand %p1842_p3, %p1841_p9  ;;  %p1848_p6 = por %p1847_p12, %p1846_p8 }
  0x96   : > { %p1844_p4 = pneg %p1843_p13  ;;  %p1850_p2 = por %p1849_p1, %p1848_p6 }
  0x98   : > { %p1851_p5 = pnand %p1850_p2, %p1844_p4 }
  0x9a   : > { %1854 = shalt.err (!%p1851_p5)
}
  0x9b   : > { %s1855_s14 = scalar_lea.vmem %s2335_s30, 1024  ;;  %s2035_s12 = smov [#allocation6]  }
  0x9c   : > { %p1856_p11 = scmp.ne.s32.totalorder %s2335_s30, %s1855_s14  ;;  %s1860_s25 = sshll.u32 %s2035_s12, 4  ;;  %s1861_s25 = int_to_ptr.vmem [resolvable:$false] %s1860_s25 }
  0x9d   : > { %s1862_s4 = scalar_lea.vmem %s1861_s25, 2048  ;;  %p1863_p9 = scmp.lt.s32.totalorder %s2335_s30, %s1861_s25 }
  0x9e   : > { %p1858_p10 = pnand %p1856_p11, %p1842_p3  ;;  %p1864_p13 = scmp.lt.s32.totalorder %s1862_s4, %s1855_s14 }
  0xa0   : > { %p1859_p7 = pneg %p1858_p10  ;;  %p1865_p8 = por %p1864_p13, %p1863_p9 }
  0xa2   : > { %p1866_p12 = pnand %p1865_p8, %p1859_p7 }
  0xa4   : > { %1869 = shalt.err (!%p1866_p12)
}
  0xa5   : > { %1600 = dma.hbm_to_vmem [thread:$0]  (!%p2331_p0), %s2327_s0, 1024, %s2335_s30, %s2337_s18, %s2033_s24, %s2033_s24, %s2034_s5  }
  0xa6   : > { %p2643_p3 = scmp.ne.s32.totalorder %s2630_s10, 0 }
  0xa7   : > { %s272_s3 = sand.u32 (!%p2643_p3), 1, %s2004_s22   ;;  %p2644_p4 = scmp.ne.s32.totalorder (!%p2643_p3), %s2624_s6, 0 }
  0xa8   : > { %270 = sbr.rel (%p2643_p3) target bundleno = 540 (0x21c), region = 36  ;;  %s1286_s8 = sshll.u32 (!%p2643_p3), %s272_s3, 7 }
  0xa9   : > { %s273_s13 = scalar_lea.sflag (!%p2643_p3), [#allocation4], %s272_s3  ;;  %s2371_s21 = scalar_lea.vmem (!%p2643_p3), [#allocation3], %s1286_s8 }
  0xaf   : > { %1955 = dma.done.wait (%p2644_p4), %s273_s13, 2048  }
  0xb0   : > { %1957 = vsyncadd (%p2644_p4), %s273_s13, 4294965248  ;;  %s281_s11 = sand.u32 1, %s2132_s29   ;;  %s283_s0 = sand.u32 1, %s1992_s19  }
  0xb1   : > { %s1287_s24 = sshll.u32 %s283_s0, 6  ;;  %s282_s10 = scalar_lea.sflag [#allocation7], %s281_s11 }
  0xb2   : > { %s2379_s5 = scalar_lea.vmem [#allocation6], %s1287_s24  ;;  %p2645_p0 = scmp.ne.s32.totalorder %s2625_s7, 0 }
  0xb4   : > { %1959 = dma.done.wait (%p2645_p0), %s282_s10, 1024  }
  0xb5   : > { %1961 = vsyncadd (%p2645_p0), %s282_s10, 4294966272  ;;  %p2646_p6 = scmp.eq.s32.totalorder %s2132_s29, 0 }
  0xb7   : > { %1963 = dma.done.wait (%p2646_p6), [#allocation7], 16   ;;  %p2647_p1 = pmov %p2646_p6 }
  0xb9   : > { %1965 = vsyncadd (%p2647_p1), [#allocation7], 4294967280  ;;  %p2648_p2 = pmov %p2647_p1 }
  0xba   : > { %p2649_p5 = pmov %p2647_p1 }
  0xbb   : > { %1967 = dma.done.wait (%p2648_p2), [#allocation10], 16  }
  0xbc   : > { %1969 = vsyncadd (%p2649_p5), [#allocation10], 4294967280  ;;  %s2650_s6 = sld [smem:[#allocation18_spill]]  ;;  %s2651_s7 = sld [smem:[#allocation19_spill]] }
  0xc2   : > { %s320_s30 = sand.u32 1, %s2650_s6   ;;  %p1291_p11 = scmp.ne.s32.totalorder %s2651_s7, 0 }
  0xc3   : > { %s1290_s18 = sshll.u32 %s320_s30, 7  ;;  %v2036_v0 = vmov (!%p1291_p11), 0.0  }
  0xc4   : > { %s2396_s9 = scalar_lea.vmem [#allocation11], %s1290_s18  ;;  %329 = sbr.rel (%p1291_p11) target bundleno = 212 (0xd4), region = 56  ;;  %330 = vst [vmem:[#allocation2] sm:$0xff] (!%p1291_p11), %v2036_v0  ;;  %331 = vst [vmem:[#allocation2 + $0x8] sm:$0xff] (!%p1291_p11), %v2036_v0 }
  0xc5   : > { %332 = vst [vmem:[#allocation2 + $0x10] sm:$0xff] (!%p1291_p11), %v2036_v0  ;;  %333 = vst [vmem:[#allocation2 + $0x18] sm:$0xff] (!%p1291_p11), %v2036_v0 }
  0xc6   : > { %334 = vst [vmem:[#allocation2 + $0x20] sm:$0xff] (!%p1291_p11), %v2036_v0  ;;  %335 = vst [vmem:[#allocation2 + $0x28] sm:$0xff] (!%p1291_p11), %v2036_v0 }
  0xc7   : > { %336 = vst [vmem:[#allocation2 + $0x30] sm:$0xff] (!%p1291_p11), %v2036_v0  ;;  %337 = vst [vmem:[#allocation2 + $0x38] sm:$0xff] (!%p1291_p11), %v2036_v0 }
  0xc8   : > { %338 = vst [vmem:[#allocation2 + $0x40] sm:$0xff] (!%p1291_p11), %v2036_v0  ;;  %339 = vst [vmem:[#allocation2 + $0x48] sm:$0xff] (!%p1291_p11), %v2036_v0 }
  0xc9   : > { %340 = vst [vmem:[#allocation2 + $0x50] sm:$0xff] (!%p1291_p11), %v2036_v0  ;;  %341 = vst [vmem:[#allocation2 + $0x58] sm:$0xff] (!%p1291_p11), %v2036_v0 }
  0xca   : > { %342 = vst [vmem:[#allocation2 + $0x60] sm:$0xff] (!%p1291_p11), %v2036_v0  ;;  %343 = vst [vmem:[#allocation2 + $0x68] sm:$0xff] (!%p1291_p11), %v2036_v0 }
  0xcb   : > { %344 = vst [vmem:[#allocation2 + $0x70] sm:$0xff] %v2036_v0  ;;  %345 = vst [vmem:[#allocation2 + $0x78] sm:$0xff] %v2036_v0 }
  0xcc   : > { %346 = vst [vmem:[#allocation2 + $0x80] sm:$0xff] %v2036_v0  ;;  %347 = vst [vmem:[#allocation2 + $0x88] sm:$0xff] %v2036_v0 }
  0xcd   : > { %348 = vst [vmem:[#allocation2 + $0x90] sm:$0xff] %v2036_v0  ;;  %349 = vst [vmem:[#allocation2 + $0x98] sm:$0xff] %v2036_v0 }
  0xce   : > { %350 = vst [vmem:[#allocation2 + $0xa0] sm:$0xff] %v2036_v0  ;;  %351 = vst [vmem:[#allocation2 + $0xa8] sm:$0xff] %v2036_v0 }
  0xcf   : > { %352 = vst [vmem:[#allocation2 + $0xb0] sm:$0xff] %v2036_v0  ;;  %353 = vst [vmem:[#allocation2 + $0xb8] sm:$0xff] %v2036_v0 }
  0xd0   : > { %354 = vst [vmem:[#allocation2 + $0xc0] sm:$0xff] %v2036_v0  ;;  %355 = vst [vmem:[#allocation2 + $0xc8] sm:$0xff] %v2036_v0 }
  0xd1   : > { %356 = vst [vmem:[#allocation2 + $0xd0] sm:$0xff] %v2036_v0  ;;  %357 = vst [vmem:[#allocation2 + $0xd8] sm:$0xff] %v2036_v0 }
  0xd2   : > { %358 = vst [vmem:[#allocation2 + $0xe0] sm:$0xff] %v2036_v0  ;;  %359 = vst [vmem:[#allocation2 + $0xe8] sm:$0xff] %v2036_v0 }
  0xd3   : > { %360 = vst [vmem:[#allocation2 + $0xf0] sm:$0xff] %v2036_v0  ;;  %361 = vst [vmem:[#allocation2 + $0xf8] sm:$0xff] %v2036_v0 }
  0xd4 PF: > { %v1730_v1 = vld [vmem:[%s2379_s5] sm:$0xff]   ;;  %v1731_v2 = vld [vmem:[%s2379_s5 + $0x8] sm:$0xff]   ;;  %v1732_v3 = vld [vmem:[%s2379_s5 + $0x10] sm:$0xff]   ;;  %s2652_s29 = sld [smem:[#allocation19_spill]] }
  0xd5   : > { %1509 = vmatprep.subr.bf16.mxu0 %v1730_v1  ;;  %1557 = vmatprep.subr.bf16.mxu1 %v1730_v1  ;;  %v1733_v4 = vld [vmem:[%s2379_s5 + $0x18] sm:$0xff]   ;;  %v1738_v5 = vld [vmem:[%s2371_s21] sm:$0xff]   ;;  %v1735_v8 = vld [vmem:[%s2379_s5 + $0x28] sm:$0xff]  }
  0xd6   : > { %1510 = vmatpush3.bf16.msra.mxu0 %v1730_v1  ;;  %1565 = vmatpush3.bf16.msra.mxu1 %v1730_v1  ;;  %v1739_v6 = vld [vmem:[%s2371_s21 + $0x40] sm:$0xff]   ;;  %v1736_v9 = vld [vmem:[%s2379_s5 + $0x30] sm:$0xff]   ;;  %v1737_v10 = vld [vmem:[%s2379_s5 + $0x38] sm:$0xff]  }
  0xd7   : > { %1511 = vmatprep.subr.bf16.mxu0 %v1731_v2  ;;  %1558 = vmatprep.subr.bf16.mxu1 %v1731_v2  ;;  %v1734_v7 = vld [vmem:[%s2379_s5 + $0x20] sm:$0xff]   ;;  %v1740_v11 = vld [vmem:[%s2371_s21 + $0x8] sm:$0xff]   ;;  %v1742_v13 = vld [vmem:[%s2371_s21 + $0x10] sm:$0xff]  }
  0xd8   : > { %1525 = vmatprep.mubr.bf16.mxu0 %v1738_v5  ;;  %1541 = vmatprep.mubr.bf16.mxu1 %v1739_v6  ;;  %v1741_v12 = vld [vmem:[%s2371_s21 + $0x48] sm:$0xff]   ;;  %v1743_v14 = vld [vmem:[%s2371_s21 + $0x50] sm:$0xff]   ;;  %v1744_v15 = vld [vmem:[%s2371_s21 + $0x18] sm:$0xff]  }
  0xd9   : > { %v1745_v16 = vld [vmem:[%s2371_s21 + $0x58] sm:$0xff]   ;;  %v1746_v17 = vld [vmem:[%s2371_s21 + $0x20] sm:$0xff]   ;;  %v1748_v19 = vld [vmem:[%s2371_s21 + $0x28] sm:$0xff]  }
  0xda   : > { %1512 = vmatpush3.bf16.msra.mxu0 %v1731_v2  ;;  %1566 = vmatpush3.bf16.msra.mxu1 %v1731_v2  ;;  %v1747_v18 = vld [vmem:[%s2371_s21 + $0x60] sm:$0xff]   ;;  %v1749_v20 = vld [vmem:[%s2371_s21 + $0x68] sm:$0xff]   ;;  %v1750_v21 = vld [vmem:[%s2371_s21 + $0x30] sm:$0xff]   ;;  %p1316_p10 = scmp.ne.s32.totalorder %s2652_s29, 48 }
  0xdb   : > { %1513 = vmatprep.subr.bf16.mxu0 %v1732_v3  ;;  %1559 = vmatprep.subr.bf16.mxu1 %v1732_v3  ;;  %v1751_v22 = vld [vmem:[%s2371_s21 + $0x70] sm:$0xff]   ;;  %v1752_v23 = vld [vmem:[%s2371_s21 + $0x38] sm:$0xff]   ;;  %v362_v27 = vld [vmem:[#allocation2] sm:$0xff] }
  0xdc   : > { %v1753_v24 = vld [vmem:[%s2371_s21 + $0x78] sm:$0xff]   ;;  %v364_v25 = vld [vmem:[#allocation2 + $0x10] sm:$0xff]  ;;  %v378_v28 = vld [vmem:[#allocation2 + $0x80] sm:$0xff] }
  0xdd   : > { %v380_v26 = vld [vmem:[#allocation2 + $0x90] sm:$0xff]  ;;  %v365_v31 = vld [vmem:[#allocation2 + $0x18] sm:$0xff]  ;;  %v363_v37 = vld [vmem:[#allocation2 + $0x8] sm:$0xff] }
  0xde   : > { %1514 = vmatpush3.bf16.msra.mxu0 %v1732_v3  ;;  %1567 = vmatpush3.bf16.msra.mxu1 %v1732_v3  ;;  %v381_v32 = vld [vmem:[#allocation2 + $0x98] sm:$0xff]  ;;  %v379_v38 = vld [vmem:[#allocation2 + $0x88] sm:$0xff]  ;;  %v368_v49 = vld [vmem:[#allocation2 + $0x30] sm:$0xff] }
  0xdf   : > { %1515 = vmatprep.subr.bf16.mxu0 %v1733_v4  ;;  %1560 = vmatprep.subr.bf16.mxu1 %v1733_v4  ;;  %v384_v50 = vld [vmem:[#allocation2 + $0xb0] sm:$0xff]  ;;  %v366_v51 = vld [vmem:[#allocation2 + $0x20] sm:$0xff]  ;;  %v369_v55 = vld [vmem:[#allocation2 + $0x38] sm:$0xff] }
  0xe0   : > { %v382_v52 = vld [vmem:[#allocation2 + $0xa0] sm:$0xff]  ;;  %v385_v56 = vld [vmem:[#allocation2 + $0xb8] sm:$0xff]  ;;  %v367_v61 = vld [vmem:[#allocation2 + $0x28] sm:$0xff] }
  0xe1   : > { %v383_v62 = vld [vmem:[#allocation2 + $0xa8] sm:$0xff] }
  0xe2   : > { %1516 = vmatpush3.bf16.msra.mxu0 %v1733_v4  ;;  %1568 = vmatpush3.bf16.msra.mxu1 %v1733_v4 }
  0xe3   : > { %1517 = vmatprep.subr.bf16.mxu0 %v1734_v7  ;;  %1561 = vmatprep.subr.bf16.mxu1 %v1734_v7 }
  0xe6   : > { %1518 = vmatpush3.bf16.msra.mxu0 %v1734_v7  ;;  %1569 = vmatpush3.bf16.msra.mxu1 %v1734_v7 }
  0xe7   : > { %1519 = vmatprep.subr.bf16.mxu0 %v1735_v8  ;;  %1562 = vmatprep.subr.bf16.mxu1 %v1735_v8 }
  0xea   : > { %1520 = vmatpush3.bf16.msra.mxu0 %v1735_v8  ;;  %1570 = vmatpush3.bf16.msra.mxu1 %v1735_v8 }
  0xeb   : > { %1521 = vmatprep.subr.bf16.mxu0 %v1736_v9  ;;  %1563 = vmatprep.subr.bf16.mxu1 %v1736_v9 }
  0xee   : > { %1522 = vmatpush3.bf16.msra.mxu0 %v1736_v9  ;;  %1571 = vmatpush3.bf16.msra.mxu1 %v1736_v9  ;;  %v372_v9 = vld [vmem:[#allocation2 + $0x50] sm:$0xff] }
  0xef   : > { %1523 = vmatprep.subr.bf16.mxu0 %v1737_v10  ;;  %1564 = vmatprep.subr.bf16.mxu1 %v1737_v10 }
  0xf2   : > { %1524 = vmatpush3.bf16.msra.mxu0 %v1737_v10  ;;  %1572 = vmatpush3.bf16.msra.mxu1 %v1737_v10  ;;  %v388_v10 = vld [vmem:[#allocation2 + $0xd0] sm:$0xff] }
  0xf5   : > { %1526 = vmatmul.mubr.bf16.vlgmr.msra.gmra.mrb[0].mxu0 %v1740_v11  ;;  %1542 = vmatmul.mubr.bf16.vlgmr.msra.gmra.mrb[0].mxu1 %v1741_v12  ;;  %v370_v11 = vld [vmem:[#allocation2 + $0x40] sm:$0xff] }
  0xf6   : > { %1529 = vmatprep.mubr.bf16.mxu0 %v1742_v13  ;;  %1545 = vmatprep.mubr.bf16.mxu1 %v1743_v14  ;;  %v386_v12 = vld [vmem:[#allocation2 + $0xc0] sm:$0xff] }
  0xfd   : > { %1530 = vmatmul.mubr.bf16.gmra.mrb[4].mxu0 %v1744_v15  ;;  %1546 = vmatmul.mubr.bf16.gmra.mrb[4].mxu1 %v1745_v16  ;;  %v373_v15 = vld [vmem:[#allocation2 + $0x58] sm:$0xff] }
  0xfe   : > { %1533 = vmatprep.mubr.bf16.mxu0 %v1746_v17  ;;  %1549 = vmatprep.mubr.bf16.mxu1 %v1747_v18  ;;  %v389_v16 = vld [vmem:[#allocation2 + $0xd8] sm:$0xff] }
 0x105   : > { %1534 = vmatmul.mubr.bf16.gmra.mrb[8].mxu0 %v1748_v19  ;;  %1550 = vmatmul.mubr.bf16.gmra.mrb[8].mxu1 %v1749_v20 }
 0x106   : > { %1537 = vmatprep.mubr.bf16.mxu0 %v1750_v21  ;;  %1553 = vmatprep.mubr.bf16.mxu1 %v1751_v22  ;;  %v371_v21 = vld [vmem:[#allocation2 + $0x48] sm:$0xff] }
 0x107   : > { %v387_v22 = vld [vmem:[#allocation2 + $0xc8] sm:$0xff] }
 0x10d   : > { %1538 = vmatmul.mubr.bf16.gmra.mrb[12].mxu0 %v1752_v23  ;;  %1554 = vmatmul.mubr.bf16.gmra.mrb[12].mxu1 %v1753_v24 }
 0x1c8   : > { %v1527_v29 = vpop.f32.mrb[0].mxu0  ;;  %v1543_v30 = vpop.f32.mrb[0].mxu1 }
 0x1c9   : > { %v749_v33 = vadd.f32 %v1527_v29, %v364_v25  ;;  %v765_v34 = vadd.f32 %v1543_v30, %v380_v26  ;;  %v620_v35 = vpop.f32.mrb[1].mxu0  ;;  %v684_v36 = vpop.f32.mrb[1].mxu1 }
 0x1ca   : > { %v747_v39 = vadd.f32 %v620_v35, %v362_v27  ;;  %v763_v40 = vadd.f32 %v684_v36, %v378_v28  ;;  %v1528_v41 = vpop.f32.mrb[2].mxu0  ;;  %v1544_v42 = vpop.f32.mrb[2].mxu1  ;;  %v374_v35 = vld [vmem:[#allocation2 + $0x60] sm:$0xff] }
 0x1cb   : > { %781 = vst [vmem:[#allocation2 + $0x10] sm:$0xff] %v749_v33  ;;  %797 = vst [vmem:[#allocation2 + $0x90] sm:$0xff] %v765_v34  ;;  %v750_v43 = vadd.f32 %v1528_v41, %v365_v31  ;;  %v766_v44 = vadd.f32 %v1544_v42, %v381_v32  ;;  %v623_v45 = vpop.f32.mrb[3].mxu0  ;;  %v687_v46 = vpop.f32.mrb[3].mxu1  ;;  %v376_v33 = vld [vmem:[#allocation2 + $0x70] sm:$0xff]  ;;  %v390_v36 = vld [vmem:[#allocation2 + $0xe0] sm:$0xff] }
 0x1cc   : > { %779 = vst [vmem:[#allocation2] sm:$0xff] %v747_v39  ;;  %795 = vst [vmem:[#allocation2 + $0x80] sm:$0xff] %v763_v40  ;;  %v748_v47 = vadd.f32 %v623_v45, %v363_v37  ;;  %v764_v48 = vadd.f32 %v687_v46, %v379_v38  ;;  %v392_v34 = vld [vmem:[#allocation2 + $0xf0] sm:$0xff]  ;;  %v377_v39 = vld [vmem:[#allocation2 + $0x78] sm:$0xff] }
 0x1cd   : > { %782 = vst [vmem:[#allocation2 + $0x18] sm:$0xff] %v750_v43  ;;  %798 = vst [vmem:[#allocation2 + $0x98] sm:$0xff] %v766_v44  ;;  %v393_v40 = vld [vmem:[#allocation2 + $0xf8] sm:$0xff]  ;;  %v375_v45 = vld [vmem:[#allocation2 + $0x68] sm:$0xff] }
 0x1ce   : > { %780 = vst [vmem:[#allocation2 + $0x8] sm:$0xff] %v748_v47  ;;  %796 = vst [vmem:[#allocation2 + $0x88] sm:$0xff] %v764_v48  ;;  %v391_v46 = vld [vmem:[#allocation2 + $0xe8] sm:$0xff] }
 0x1d0   : > { %v1531_v53 = vpop.f32.mrb[4].mxu0  ;;  %v1547_v54 = vpop.f32.mrb[4].mxu1 }
 0x1d1   : > { %v753_v57 = vadd.f32 %v1531_v53, %v368_v49  ;;  %v769_v58 = vadd.f32 %v1547_v54, %v384_v50  ;;  %v636_v59 = vpop.f32.mrb[5].mxu0  ;;  %v700_v60 = vpop.f32.mrb[5].mxu1 }
 0x1d2   : > { %v751_v63 = vadd.f32 %v636_v59, %v366_v51  ;;  %v767_v0 = vadd.f32 %v700_v60, %v382_v52  ;;  %v1532_v1 = vpop.f32.mrb[6].mxu0  ;;  %v1548_v2 = vpop.f32.mrb[6].mxu1  ;;  %v2424_v59 = vld [vmem:[#allocation8] ss:$0 sm:$0xff] (!%p1316_p10) }
 0x1d3   : > { %785 = vst [vmem:[#allocation2 + $0x30] sm:$0xff] %v753_v57  ;;  %801 = vst [vmem:[#allocation2 + $0xb0] sm:$0xff] %v769_v58  ;;  %v754_v3 = vadd.f32 %v1532_v1, %v369_v55  ;;  %v770_v4 = vadd.f32 %v1548_v2, %v385_v56  ;;  %v639_v5 = vpop.f32.mrb[7].mxu0  ;;  %v703_v6 = vpop.f32.mrb[7].mxu1  ;;  %v815_v57 = vld [vmem:[#allocation2] sm:$0xff] (!%p1316_p10) }
 0x1d4   : > { %783 = vst [vmem:[#allocation2 + $0x20] sm:$0xff] %v751_v63  ;;  %799 = vst [vmem:[#allocation2 + $0xa0] sm:$0xff] %v767_v0  ;;  %v752_v7 = vadd.f32 %v639_v5, %v367_v61  ;;  %v768_v8 = vadd.f32 %v703_v6, %v383_v62  ;;  %v854_v60 = vmul.f32 (!%p1316_p10), %v2424_v59, %v815_v57  ;;  %v2428_v62 = vld [vmem:[#allocation9] ss:$0 sm:$0xff] (!%p1316_p10)  ;;  %v817_v63 = vld [vmem:[#allocation2 + $0x10] sm:$0xff] (!%p1316_p10) }
 0x1d5   : > { %786 = vst [vmem:[#allocation2 + $0x38] sm:$0xff] %v754_v3  ;;  %802 = vst [vmem:[#allocation2 + $0xb8] sm:$0xff] %v770_v4  ;;  %v816_v58 = vld [vmem:[#allocation2 + $0x8] sm:$0xff] (!%p1316_p10)  ;;  %v818_v0 = vld [vmem:[#allocation2 + $0x18] sm:$0xff] (!%p1316_p10)  ;;  %v856_v1 = vmul.f32 (!%p1316_p10), %v2424_v59, %v817_v63 }
 0x1d6   : > { %784 = vst [vmem:[#allocation2 + $0x28] sm:$0xff] %v752_v7  ;;  %800 = vst [vmem:[#allocation2 + $0xa8] sm:$0xff] %v768_v8  ;;  %v855_v61 = vmul.f32 (!%p1316_p10), %v2424_v59, %v816_v58  ;;  %v857_v2 = vmul.f32 (!%p1316_p10), %v2424_v59, %v818_v0  ;;  %v893_v6 = vadd.f32 (!%p1316_p10), %v2428_v62, %v854_v60  ;;  %v833_v63 = vld [vmem:[#allocation2 + $0x90] sm:$0xff] (!%p1316_p10)  ;;  %v834_v0 = vld [vmem:[#allocation2 + $0x98] sm:$0xff] (!%p1316_p10) }
 0x1d8   : > { %v1535_v13 = vpop.f32.mrb[8].mxu0  ;;  %v1551_v14 = vpop.f32.mrb[8].mxu1  ;;  %v894_v7 = vadd.f32 (!%p1316_p10), %v2428_v62, %v855_v61 }
 0x1d9   : > { %v757_v17 = vadd.f32 %v1535_v13, %v372_v9  ;;  %v773_v18 = vadd.f32 %v1551_v14, %v388_v10  ;;  %v652_v19 = vpop.f32.mrb[9].mxu0  ;;  %v716_v20 = vpop.f32.mrb[9].mxu1 }
 0x1da   : > { %v755_v23 = vadd.f32 %v652_v19, %v370_v11  ;;  %v771_v24 = vadd.f32 %v716_v20, %v386_v12  ;;  %v1536_v25 = vpop.f32.mrb[10].mxu0  ;;  %v1552_v26 = vpop.f32.mrb[10].mxu1  ;;  %v821_v5 = vld [vmem:[#allocation2 + $0x30] sm:$0xff] (!%p1316_p10)  ;;  %v895_v11 = vadd.f32 (!%p1316_p10), %v2428_v62, %v856_v1  ;;  %v896_v12 = vadd.f32 (!%p1316_p10), %v2428_v62, %v857_v2 }
 0x1db   : > { %789 = vst [vmem:[#allocation2 + $0x50] sm:$0xff] %v757_v17  ;;  %805 = vst [vmem:[#allocation2 + $0xd0] sm:$0xff] %v773_v18  ;;  %v758_v27 = vadd.f32 %v1536_v25, %v373_v15  ;;  %v774_v28 = vadd.f32 %v1552_v26, %v389_v16  ;;  %v655_v29 = vpop.f32.mrb[11].mxu0  ;;  %v719_v30 = vpop.f32.mrb[11].mxu1  ;;  %v819_v3 = vld [vmem:[#allocation2 + $0x20] sm:$0xff] (!%p1316_p10)  ;;  %v860_v13 = vmul.f32 (!%p1316_p10), %v2424_v59, %v821_v5  ;;  %v925_v16 = vmax.f32 (!%p1316_p10), %v893_v6, 0.0 }
 0x1dc   : > { %787 = vst [vmem:[#allocation2 + $0x40] sm:$0xff] %v755_v23  ;;  %803 = vst [vmem:[#allocation2 + $0xc0] sm:$0xff] %v771_v24  ;;  %v756_v31 = vadd.f32 %v655_v29, %v371_v21  ;;  %v772_v32 = vadd.f32 %v719_v30, %v387_v22  ;;  %v858_v8 = vmul.f32 (!%p1316_p10), %v2424_v59, %v819_v3  ;;  %v822_v10 = vld [vmem:[#allocation2 + $0x38] sm:$0xff] (!%p1316_p10)  ;;  %v926_v17 = vmax.f32 (!%p1316_p10), %v894_v7, 0.0  ;;  %v835_v5 = vld [vmem:[#allocation2 + $0xa0] sm:$0xff] (!%p1316_p10) }
 0x1dd   : > { %790 = vst [vmem:[#allocation2 + $0x58] sm:$0xff] %v758_v27  ;;  %806 = vst [vmem:[#allocation2 + $0xd8] sm:$0xff] %v774_v28  ;;  %v820_v4 = vld [vmem:[#allocation2 + $0x28] sm:$0xff] (!%p1316_p10)  ;;  %v861_v14 = vmul.f32 (!%p1316_p10), %v2424_v59, %v822_v10  ;;  %v927_v21 = vmax.f32 (!%p1316_p10), %v895_v11, 0.0  ;;  %v928_v22 = vmax.f32 (!%p1316_p10), %v896_v12, 0.0  ;;  %v899_v23 = vadd.f32 (!%p1316_p10), %v2428_v62, %v860_v13  ;;  %v837_v11 = vld [vmem:[#allocation2 + $0xb0] sm:$0xff] (!%p1316_p10) }
 0x1de   : > { %788 = vst [vmem:[#allocation2 + $0x48] sm:$0xff] %v756_v31  ;;  %804 = vst [vmem:[#allocation2 + $0xc8] sm:$0xff] %v772_v32  ;;  %v859_v9 = vmul.f32 (!%p1316_p10), %v2424_v59, %v820_v4  ;;  %v897_v18 = vadd.f32 (!%p1316_p10), %v2428_v62, %v858_v8  ;;  %v1393_v27 = vpack.c.bf16 (!%p1316_p10), %v926_v17, %v925_v16  ;;  %v836_v6 = vld [vmem:[#allocation2 + $0xa8] sm:$0xff] (!%p1316_p10)  ;;  %v838_v16 = vld [vmem:[#allocation2 + $0xb8] sm:$0xff] (!%p1316_p10) }
 0x1df   : > { %v900_v24 = vadd.f32 (!%p1316_p10), %v2428_v62, %v861_v14  ;;  %v872_v14 = vmul.f32 (!%p1316_p10), %v2424_v59, %v833_v63 }
 0x1e0   : > { %v1539_v37 = vpop.f32.mrb[12].mxu0  ;;  %v1555_v38 = vpop.f32.mrb[12].mxu1  ;;  %814 = sbr.rel (%p1316_p10) target bundleno = 512 (0x200), region = 60  ;;  %v898_v19 = vadd.f32 (!%p1316_p10), %v2428_v62, %v859_v9  ;;  %v929_v28 = vmax.f32 (!%p1316_p10), %v897_v18, 0.0  ;;  %1394 = vst [vmem:[%s2396_s9] sm:$0xff] (!%p1316_p10), %v1393_v27  }
 0x1e1   : > { %v761_v41 = vadd.f32 %v1539_v37, %v376_v33  ;;  %v777_v42 = vadd.f32 %v1555_v38, %v392_v34  ;;  %v668_v43 = vpop.f32.mrb[13].mxu0  ;;  %v732_v44 = vpop.f32.mrb[13].mxu1  ;;  %v1398_v33 = vpack.c.bf16 (!%p1316_p10), %v928_v22, %v927_v21  ;;  %v931_v34 = vmax.f32 (!%p1316_p10), %v899_v23, 0.0 }
 0x1e2   : > { %v759_v47 = vadd.f32 %v668_v43, %v374_v35  ;;  %v775_v48 = vadd.f32 %v732_v44, %v390_v36  ;;  %v1540_v49 = vpop.f32.mrb[14].mxu0  ;;  %v1556_v50 = vpop.f32.mrb[14].mxu1  ;;  %v825_v25 = vld [vmem:[#allocation2 + $0x50] sm:$0xff] (!%p1316_p10)  ;;  %v930_v29 = vmax.f32 (!%p1316_p10), %v898_v19, 0.0  ;;  %v932_v35 = vmax.f32 (!%p1316_p10), %v900_v24, 0.0 }
 0x1e3   : > { %793 = vst [vmem:[#allocation2 + $0x70] sm:$0xff] %v761_v41  ;;  %809 = vst [vmem:[#allocation2 + $0xf0] sm:$0xff] %v777_v42  ;;  %v762_v51 = vadd.f32 %v1540_v49, %v377_v39  ;;  %v778_v52 = vadd.f32 %v1556_v50, %v393_v40  ;;  %v671_v53 = vpop.f32.mrb[15].mxu0  ;;  %v735_v54 = vpop.f32.mrb[15].mxu1  ;;  %v823_v15 = vld [vmem:[#allocation2 + $0x40] sm:$0xff] (!%p1316_p10)  ;;  %v864_v40 = vmul.f32 (!%p1316_p10), %v2424_v59, %v825_v25 }
 0x1e4   : > { %791 = vst [vmem:[#allocation2 + $0x60] sm:$0xff] %v759_v47  ;;  %807 = vst [vmem:[#allocation2 + $0xe0] sm:$0xff] %v775_v48  ;;  %v760_v55 = vadd.f32 %v671_v53, %v375_v45  ;;  %v776_v56 = vadd.f32 %v735_v54, %v391_v46  ;;  %v826_v26 = vld [vmem:[#allocation2 + $0x58] sm:$0xff] (!%p1316_p10)  ;;  %v862_v30 = vmul.f32 (!%p1316_p10), %v2424_v59, %v823_v15  ;;  %v831_v47 = vld [vmem:[#allocation2 + $0x80] sm:$0xff] (!%p1316_p10) }
 0x1e5   : > { %794 = vst [vmem:[#allocation2 + $0x78] sm:$0xff] %v762_v51  ;;  %810 = vst [vmem:[#allocation2 + $0xf8] sm:$0xff] %v778_v52  ;;  %v824_v20 = vld [vmem:[#allocation2 + $0x48] sm:$0xff] (!%p1316_p10)  ;;  %v1403_v38 = vpack.c.bf16 (!%p1316_p10), %v930_v29, %v929_v28  ;;  %v865_v41 = vmul.f32 (!%p1316_p10), %v2424_v59, %v826_v26  ;;  %v1408_v43 = vpack.c.bf16 (!%p1316_p10), %v932_v35, %v931_v34  ;;  %v839_v21 = vld [vmem:[#allocation2 + $0xc0] sm:$0xff] (!%p1316_p10) }
 0x1e6   : > { %792 = vst [vmem:[#allocation2 + $0x68] sm:$0xff] %v760_v55  ;;  %808 = vst [vmem:[#allocation2 + $0xe8] sm:$0xff] %v776_v56  ;;  %v863_v36 = vmul.f32 (!%p1316_p10), %v2424_v59, %v824_v20  ;;  %v901_v39 = vadd.f32 (!%p1316_p10), %v2428_v62, %v862_v30  ;;  %v903_v49 = vadd.f32 (!%p1316_p10), %v2428_v62, %v864_v40  ;;  %v832_v56 = vld [vmem:[#allocation2 + $0x88] sm:$0xff] (!%p1316_p10)  ;;  %v841_v35 = vld [vmem:[#allocation2 + $0xd0] sm:$0xff] (!%p1316_p10) }
 0x1e7   : > { %1470 = vst [vmem:[%s2396_s9 + $0x8] sm:$0xff] %v1398_v33   ;;  %1471 = vst [vmem:[%s2396_s9 + $0x10] sm:$0xff] %v1403_v38   ;;  %v904_v50 = vadd.f32 %v2428_v62, %v865_v41  ;;  %v870_v61 = vmul.f32 %v2424_v59, %v831_v47  ;;  %v871_v9 = vmul.f32 %v2424_v59, %v832_v56  ;;  %v840_v30 = vld [vmem:[#allocation2 + $0xc8] sm:$0xff] }
 0x1e8   : > { %v902_v44 = vadd.f32 %v2428_v62, %v863_v36  ;;  %v933_v48 = vmax.f32 %v901_v39, 0.0  ;;  %1472 = vst [vmem:[%s2396_s9 + $0x18] sm:$0xff] %v1408_v43   ;;  %v935_v57 = vmax.f32 %v903_v49, 0.0  ;;  %v873_v15 = vmul.f32 %v2424_v59, %v834_v0  ;;  %v842_v36 = vld [vmem:[#allocation2 + $0xd8] sm:$0xff] }
 0x1e9   : > { %v936_v58 = vmax.f32 %v904_v50, 0.0  ;;  %v909_v10 = vadd.f32 %v2428_v62, %v870_v61  ;;  %v910_v17 = vadd.f32 %v2428_v62, %v871_v9  ;;  %v874_v19 = vmul.f32 %v2424_v59, %v835_v5 }
 0x1ea   : > { %v829_v37 = vld [vmem:[#allocation2 + $0x70] sm:$0xff]  ;;  %v934_v52 = vmax.f32 %v902_v44, 0.0  ;;  %v875_v20 = vmul.f32 %v2424_v59, %v836_v6  ;;  %v911_v23 = vadd.f32 %v2428_v62, %v872_v14  ;;  %v912_v24 = vadd.f32 %v2428_v62, %v873_v15 }
 0x1eb   : > { %v827_v31 = vld [vmem:[#allocation2 + $0x60] sm:$0xff]  ;;  %v868_v51 = vmul.f32 %v2424_v59, %v829_v37  ;;  %v1418_v7 = vpack.c.bf16 %v936_v58, %v935_v57  ;;  %v941_v18 = vmax.f32 %v909_v10, 0.0  ;;  %v876_v25 = vmul.f32 %v2424_v59, %v837_v11  ;;  %v845_v47 = vld [vmem:[#allocation2 + $0xf0] sm:$0xff] }
 0x1ec   : > { %v830_v42 = vld [vmem:[#allocation2 + $0x78] sm:$0xff]  ;;  %v866_v45 = vmul.f32 %v2424_v59, %v827_v31  ;;  %v1413_v1 = vpack.c.bf16 %v934_v52, %v933_v48  ;;  %v942_v26 = vmax.f32 %v910_v17, 0.0  ;;  %v913_v27 = vadd.f32 %v2428_v62, %v874_v19  ;;  %v843_v41 = vld [vmem:[#allocation2 + $0xe0] sm:$0xff] }
 0x1ed   : > { %v828_v32 = vld [vmem:[#allocation2 + $0x68] sm:$0xff]  ;;  %v869_v55 = vmul.f32 %v2424_v59, %v830_v42  ;;  %v907_v60 = vadd.f32 %v2428_v62, %v868_v51  ;;  %1474 = vst [vmem:[%s2396_s9 + $0x28] sm:$0xff] %v1418_v7   ;;  %v914_v28 = vadd.f32 %v2428_v62, %v875_v20  ;;  %v877_v29 = vmul.f32 %v2424_v59, %v838_v16  ;;  %v846_v52 = vld [vmem:[#allocation2 + $0xf8] sm:$0xff] }
 0x1ee   : > { %v867_v46 = vmul.f32 %v2424_v59, %v828_v32  ;;  %v905_v53 = vadd.f32 %v2428_v62, %v866_v45  ;;  %1473 = vst [vmem:[%s2396_s9 + $0x20] sm:$0xff] %v1413_v1   ;;  %v943_v31 = vmax.f32 %v911_v23, 0.0  ;;  %v944_v32 = vmax.f32 %v912_v24, 0.0  ;;  %v844_v42 = vld [vmem:[#allocation2 + $0xe8] sm:$0xff] }
 0x1ef   : > { %v908_v4 = vadd.f32 %v2428_v62, %v869_v55  ;;  %v939_v8 = vmax.f32 %v907_v60, 0.0  ;;  %v915_v33 = vadd.f32 %v2428_v62, %v876_v25  ;;  %v878_v34 = vmul.f32 %v2424_v59, %v839_v21 }
 0x1f0   : > { %v906_v54 = vadd.f32 %v2428_v62, %v867_v46  ;;  %v937_v2 = vmax.f32 %v905_v53, 0.0  ;;  %v1433_v37 = vpack.c.bf16 %v942_v26, %v941_v18  ;;  %v945_v38 = vmax.f32 %v913_v27, 0.0 }
 0x1f1   : > { %v940_v13 = vmax.f32 %v908_v4, 0.0  ;;  %v946_v39 = vmax.f32 %v914_v28, 0.0  ;;  %v916_v40 = vadd.f32 %v2428_v62, %v877_v29  ;;  %v1438_v43 = vpack.c.bf16 %v944_v32, %v943_v31 }
 0x1f2   : > { %v938_v3 = vmax.f32 %v906_v54, 0.0  ;;  %v947_v44 = vmax.f32 %v915_v33, 0.0  ;;  %v879_v45 = vmul.f32 %v2424_v59, %v840_v30  ;;  %v917_v46 = vadd.f32 %v2428_v62, %v878_v34  ;;  %1477 = vst [vmem:[%s2396_s9 + $0x40] sm:$0xff] %v1433_v37  }
 0x1f3   : > { %v1428_v22 = vpack.c.bf16 %v940_v13, %v939_v8  ;;  %v1443_v48 = vpack.c.bf16 %v946_v39, %v945_v38  ;;  %v948_v49 = vmax.f32 %v916_v40, 0.0  ;;  %v880_v50 = vmul.f32 %v2424_v59, %v841_v35  ;;  %1478 = vst [vmem:[%s2396_s9 + $0x48] sm:$0xff] %v1438_v43  }
 0x1f4   : > { %v1423_v12 = vpack.c.bf16 %v938_v3, %v937_v2  ;;  %v881_v51 = vmul.f32 %v2424_v59, %v842_v36  ;;  %v918_v53 = vadd.f32 %v2428_v62, %v879_v45  ;;  %v949_v54 = vmax.f32 %v917_v46, 0.0 }
 0x1f5   : > { %1476 = vst [vmem:[%s2396_s9 + $0x38] sm:$0xff] %v1428_v22   ;;  %v882_v55 = vmul.f32 %v2424_v59, %v843_v41  ;;  %v883_v56 = vmul.f32 %v2424_v59, %v844_v42  ;;  %1479 = vst [vmem:[%s2396_s9 + $0x50] sm:$0xff] %v1443_v48   ;;  %v1448_v57 = vpack.c.bf16 %v948_v49, %v947_v44 }
 0x1f6   : > { %1475 = vst [vmem:[%s2396_s9 + $0x30] sm:$0xff] %v1423_v12   ;;  %v919_v58 = vadd.f32 %v2428_v62, %v880_v50  ;;  %v920_v60 = vadd.f32 %v2428_v62, %v881_v51  ;;  %v884_v61 = vmul.f32 %v2424_v59, %v845_v47  ;;  %v950_v63 = vmax.f32 %v918_v53, 0.0 }
 0x1f7   : > { %v921_v0 = vadd.f32 %v2428_v62, %v882_v55  ;;  %v922_v1 = vadd.f32 %v2428_v62, %v883_v56  ;;  %v885_v2 = vmul.f32 %v2424_v59, %v846_v52  ;;  %1480 = vst [vmem:[%s2396_s9 + $0x58] sm:$0xff] %v1448_v57  }
 0x1f8   : > { %v951_v3 = vmax.f32 %v919_v58, 0.0  ;;  %v952_v4 = vmax.f32 %v920_v60, 0.0  ;;  %v923_v5 = vadd.f32 %v2428_v62, %v884_v61  ;;  %v1453_v6 = vpack.c.bf16 %v950_v63, %v949_v54 }
 0x1f9   : > { %v953_v7 = vmax.f32 %v921_v0, 0.0  ;;  %v954_v8 = vmax.f32 %v922_v1, 0.0  ;;  %v924_v9 = vadd.f32 %v2428_v62, %v885_v2 }
 0x1fa   : > { %v1458_v10 = vpack.c.bf16 %v952_v4, %v951_v3  ;;  %v955_v11 = vmax.f32 %v923_v5, 0.0  ;;  %1481 = vst [vmem:[%s2396_s9 + $0x60] sm:$0xff] %v1453_v6  }
 0x1fb   : > { %v1463_v12 = vpack.c.bf16 %v954_v8, %v953_v7  ;;  %v956_v13 = vmax.f32 %v924_v9, 0.0 }
 0x1fc   : > { %1482 = vst [vmem:[%s2396_s9 + $0x68] sm:$0xff] %v1458_v10  }
 0x1fd   : > { %1483 = vst [vmem:[%s2396_s9 + $0x70] sm:$0xff] %v1463_v12   ;;  %v1468_v14 = vpack.c.bf16 %v956_v13, %v955_v11 }
 0x1ff   : > { %1484 = vst [vmem:[%s2396_s9 + $0x78] sm:$0xff] %v1468_v14  }
 0x200 PF: > { %s2653_s14 = sld [smem:[#allocation20_spill]]  ;;  %s2655_s25 = sld [smem:[#allocation21_spill]] }
 0x201   : > { %s2656_s13 = sld [smem:[#allocation28_spill]]  ;;  %s1132_s11 = sshll.u32 %s2396_s9, 4  ;;  %s2515_s11 = int_to_ptr.vmem [resolvable:$true] %s1132_s11 }
 0x202   : > { %s2519_s0 = scalar_lea.sflag [#allocation5], %s320_s30  ;;  %s1870_s24 = scalar_lea.vmem %s2515_s11, 2048 }
 0x203   : > { %p1871_p7 = scmp.ne.s32.totalorder %s2515_s11, %s1870_s24  ;;  %s2037_s10 = smov [#allocation11]  }
 0x204   : > { %s1874_s5 = sshll.u32 %s2037_s10, 4  ;;  %s1875_s5 = int_to_ptr.vmem [resolvable:$false] %s1874_s5 }
 0x205   : > { %s1876_s6 = scalar_lea.vmem %s1875_s5, 4096  ;;  %p1877_p12 = scmp.lt.s32.totalorder %s2515_s11, %s1875_s5 }
 0x206   : > { %s1389_s4 = sshll.u32 %s2653_s14, 11  ;;  %p2657_p9 = scmp.ne.s32.totalorder %s2655_s25, 0 }
 0x207   : > { %s2512_s21 = scalar_lea.hbm %s2656_s13, %s1389_s4  ;;  %p1878_p3 = scmp.lt.s32.totalorder %s1876_s6, %s1870_s24 }
 0x208   : > { %p1872_p13 = pnand %p1871_p7, %p2657_p9 }
 0x209   : > { %p1879_p4 = por %p1878_p3, %p1877_p12 }
 0x20a   : > { %p1873_p8 = pneg %p1872_p13 }
 0x20c   : > { %p1880_p0 = pnand %p1879_p4, %p1873_p8 }
 0x20e   : > { %1883 = shalt.err (!%p1880_p0)
}
 0x20f   : > { %s1884_s30 = scalar_lea.hbm %s2512_s21, 2048  ;;  %s1888_s7 = scalar_lea.hbm %s2656_s13, 4096 }
 0x210   : > { %p1885_p6 = scmp.ne.s32.totalorder %s2512_s21, %s1884_s30  ;;  %p1889_p5 = scmp.lt.u32.totalorder %s2512_s21, %s2656_s13 }
 0x211   : > { %p1890_p11 = scmp.lt.u32.totalorder %s1888_s7, %s1884_s30  ;;  %p1892_p7 = scmp.lt.u32.totalorder %s1884_s30, %s2512_s21 }
 0x212   : > { %p1886_p1 = pnand %p1885_p6, %p2657_p9 }
 0x213   : > { %p1891_p10 = por %p1890_p11, %p1889_p5 }
 0x214   : > { %p1887_p2 = pneg %p1886_p1 }
 0x215   : > { %p1893_p13 = por %p1892_p7, %p1891_p10 }
 0x217   : > { %p1894_p8 = pnand %p1893_p13, %p1887_p2 }
 0x219   : > { %1897 = shalt.err (!%p1894_p8)
}
 0x21a   : > { %s2038_s12 = smov 64   ;;  %s2039_s4 = smov 4  }
 0x21b   : > { %1585 = dma.vmem_to_hbm [thread:$0]  (%p2657_p9), %s2515_s11, 2048, %s2512_s21, %s2519_s0, %s2038_s12, %s2038_s12, %s2039_s4  }
 0x21c PF: > { %s2658_s3 = sld [smem:[#allocation17_spill]]  ;;  %s2659_s8 = sld [smem:[#allocation22_spill]] }
 0x21d   : > { %p1610_p12 = scmp.ge.s32.totalorder %s2028_s28, 2 }
 0x222   : > { %s1147_s24 = sand.u32 1, %s2658_s3   ;;  %p2660_p3 = scmp.ne.s32.totalorder %s2659_s8, 0 }
 0x223   : > { %s1148_s10 = scalar_lea.sflag [#allocation5], %s1147_s24 }
 0x224   : > { %p1602_p4 = pnand %p1610_p12, %p2660_p3 }
 0x226   : > { %1971 = dma.done.wait (!%p1602_p4), %s1148_s10, 2048  }
 0x227   : > { %1973 = vsyncadd (!%p1602_p4), %s1148_s10, 4294965248  ;;  %s24_s28 = sadd.s32 1, %s2028_s28   ;;  %s2662_s6 = sld [smem:[#allocation18_spill]] }
 0x228   : > { %p2548_p0 = scmp.ge.s32.totalorder %s24_s28, 100   ;;  %s2663_s25 = smov %s2259_s15 }
 0x229   : > { %s2664_s21 = smov %s2318_s16  ;;  %s2665_s11 = sld [smem:[#allocation23_spill]] }
 0x22a   : > { %s2666_s0 = sld [smem:[#allocation24_spill]]  ;;  %s2668_s16 = smov %s1984_s17 }
 0x22b   : > { %s2669_s17 = smov %s2663_s25  ;;  %s2670_s18 = smov %s1992_s19 }
 0x22c   : > { %s2671_s19 = smov %s1996_s20  ;;  %s2672_s20 = smov %s2664_s21 }
 0x22d   : > { %s2667_s15 = smov %s2662_s6  ;;  %s2673_s21 = smov %s2004_s22 }
 0x22e   : > { %s2674_s22 = smov %s2008_s23  ;;  %s2675_s23 = smov %s2262_s2 }
 0x22f   : > { %s2676_s24 = smov %s2020_s26  ;;  %s2677_s25 = smov %s2024_s27 }
 0x230   : > { %s2678_s26 = smov %s2665_s11  ;;  %s2679_s27 = smov %s2666_s0 }
 0x231   :  { %23 = sbr.rel (!%p2548_p0) target bundleno = 18 (0x12), region = 112 }
 0x238   :  { %1153 = vsyncpa [#allocation4], 1 }
 0x239   :  { %1155 = vsyncpa [#allocation4 + $0x1], 1 }
 0x23a   :  { %1156 = vsyncpa [#allocation7], 1 }
 0x23b   :  { %1158 = vsyncpa [#allocation7 + $0x1], 1 }
 0x23c   :  { %1159 = vsyncpa [#allocation10], 1 }
 0x23d   :  { %1160 = vsyncpa [#allocation5], 1 }
 0x23e   :  { %1162 = vsyncpa [#allocation5 + $0x1], 1 }

</bundles_post_ra>
